<compile_context>
chip_gen: v7x
topology: tpu7x:2x2x1
jax: 0.10.0
libtpu: 0.0.40
codegen_flags: <defaults>
</compile_context>

<pallas_src>
import jax
import jax.numpy as jnp
from jax.experimental import pallas as pl
from jax.experimental.pallas import tpu as pltpu

D = 4               # input features (iris has 4 numeric columns)
Q = 2               # output features
BLOCK_N = 2048      # lane-tile size for the gridded (large-N) path
GRIDLESS_MAX_N = 2048  # at/below this, a single whole-array VMEM tile is used


def linear_kernel(w_ref, b_ref, x_ref, o_ref):
    # w_ref: [Q, D]  f32 in SMEM  (scalar reads)
    # b_ref: [Q]     f32 in SMEM  (scalar reads)
    # x_ref: [D, Nt] f32 in VMEM  (lane-dense feature rows)
    # o_ref: [Q, Nt] f32 in VMEM  (lane-dense output rows)
    #
    # Pure VPU path:  out[q, :] = b[q] + sum_k w[q, k] * x[k, :]
    for q in range(Q):                       # Q = 2, static unroll
        row = b_ref[q] + w_ref[q, 0] * x_ref[0:1, :]
        for k in range(1, D):                # D = 4, static unroll
            row = row + w_ref[q, k] * x_ref[k:k + 1, :]
        o_ref[q:q + 1, :] = row


def linear_regression_forward(x, weight, bias):
    """x: [N, D] f32, weight: [Q, D] f32, bias: [Q] f32 -> [N, Q] f32."""
    n = x.shape[0]
    # Layout plumbing (one transpose each way), not compute.
    x_t = x.astype(jnp.float32).T            # [D, N]
    weight = weight.astype(jnp.float32)      # [Q, D] -> SMEM
    bias = bias.astype(jnp.float32)          # [Q]    -> SMEM

    smem = pl.BlockSpec(memory_space=pltpu.MemorySpace.SMEM)
    vmem = pl.BlockSpec(memory_space=pltpu.MemorySpace.VMEM)

    if n <= GRIDLESS_MAX_N:
        # Gridless single-tile call: block shape == array shape, so no
        # padding or output slicing of N is needed.  Resident VMEM is only
        # (D + Q) * 4 * N bytes (~3.6 KiB at iris scale).
        out_t = pl.pallas_call(
            linear_kernel,
            out_shape=jax.ShapeDtypeStruct((Q, n), jnp.float32),
            in_specs=[smem, smem, vmem],
            out_specs=vmem,
        )(weight, bias, x_t)
    else:
        # Throughput path: lane-tiled row grid; "parallel" axis lets v7x
        # shard tiles across both TensorCores.
        n_pad = -(-n // BLOCK_N) * BLOCK_N
        if n_pad != n:
            x_t = jnp.pad(x_t, ((0, 0), (0, n_pad - n)))
        out_t = pl.pallas_call(
            linear_kernel,
            out_shape=jax.ShapeDtypeStruct((Q, n_pad), jnp.float32),
            grid=(n_pad // BLOCK_N,),
            in_specs=[
                smem,
                smem,
                pl.BlockSpec((D, BLOCK_N), lambda i: (0, i)),
            ],
            out_specs=pl.BlockSpec((Q, BLOCK_N), lambda i: (0, i)),
            compiler_params=pltpu.CompilerParams(
                dimension_semantics=("parallel",)),
        )(weight, bias, x_t)
        out_t = out_t[:, :n]

    return out_t.T                            # [N, Q]


if __name__ == "__main__":
    key = jax.random.PRNGKey(0)
    kx, kw, kb, kx2 = jax.random.split(key, 4)

    # Deterministic synthetic "iris-like" input: [150, 4] float32.
    N = 150
    x = jax.random.normal(kx, (N, D), dtype=jnp.float32)

    # Deterministic parameter init matching nn.Linear(d, q):
    # weight [q, d], bias [q], uniform(-1/sqrt(d), 1/sqrt(d)).
    bound = 1.0 / jnp.sqrt(jnp.float32(D))
    weight = jax.random.uniform(kw, (Q, D), dtype=jnp.float32,
                                minval=-bound, maxval=bound)
    bias = jax.random.uniform(kb, (Q,), dtype=jnp.float32,
                              minval=-bound, maxval=bound)

    fwd = jax.jit(linear_regression_forward)

    # Small-N (gridless, latency-bound) path.
    out = jax.block_until_ready(fwd(x, weight, bias))
    ref = x @ weight.T + bias
    assert out.shape == (N, Q)
    assert jnp.allclose(out, ref, atol=1e-5, rtol=1e-5)

    # Large-N (tiled, parallel-grid) path — exercises padding + slicing.
    N_BIG = 5000
    x_big = jax.random.normal(kx2, (N_BIG, D), dtype=jnp.float32)
    out_big = jax.block_until_ready(fwd(x_big, weight, bias))
    ref_big = x_big @ weight.T + bias
    assert out_big.shape == (N_BIG, Q)
    assert jnp.allclose(out_big, ref_big, atol=1e-5, rtol=1e-5)

    print("KERNEL_OK")
</pallas_src>

<mosaic_0001>
module attributes {stable_mosaic.version = 11 : i64} {
  func.func @linear_kernel(%arg0: memref<2x4xf32, #tpu.memory_space<smem>>, %arg1: memref<2xf32, #tpu.memory_space<smem>>, %arg2: memref<4x150xf32, #tpu.memory_space<vmem>>, %arg3: memref<2x150xf32, #tpu.memory_space<vmem>>) attributes {dimension_semantics = [], scalar_prefetch = 0 : i64, scratch_operands = 0 : i64, tpu.core_type = #tpu.core_type<tc>} {
    %c0 = arith.constant 0 : index
    %0 = memref.load %arg1[%c0] : memref<2xf32, #tpu.memory_space<smem>>
    %c0_0 = arith.constant 0 : index
    %c0_1 = arith.constant 0 : index
    %1 = memref.load %arg0[%c0_0, %c0_1] : memref<2x4xf32, #tpu.memory_space<smem>>
    %c0_2 = arith.constant 0 : index
    %c0_3 = arith.constant 0 : index
    %2 = vector.load %arg2[%c0_2, %c0_3] : memref<4x150xf32, #tpu.memory_space<vmem>>, vector<1x150xf32>
    %3 = vector.broadcast %1 : f32 to vector<1x150xf32>
    %4 = arith.mulf %3, %2 : vector<1x150xf32>
    %5 = vector.broadcast %0 : f32 to vector<1x150xf32>
    %6 = arith.addf %5, %4 : vector<1x150xf32>
    %c0_4 = arith.constant 0 : index
    %c1 = arith.constant 1 : index
    %7 = memref.load %arg0[%c0_4, %c1] : memref<2x4xf32, #tpu.memory_space<smem>>
    %c1_5 = arith.constant 1 : index
    %c0_6 = arith.constant 0 : index
    %8 = vector.load %arg2[%c1_5, %c0_6] : memref<4x150xf32, #tpu.memory_space<vmem>>, vector<1x150xf32>
    %9 = vector.broadcast %7 : f32 to vector<1x150xf32>
    %10 = arith.mulf %9, %8 : vector<1x150xf32>
    %11 = arith.addf %6, %10 : vector<1x150xf32>
    %c0_7 = arith.constant 0 : index
    %c2 = arith.constant 2 : index
    %12 = memref.load %arg0[%c0_7, %c2] : memref<2x4xf32, #tpu.memory_space<smem>>
    %c2_8 = arith.constant 2 : index
    %c0_9 = arith.constant 0 : index
    %13 = vector.load %arg2[%c2_8, %c0_9] : memref<4x150xf32, #tpu.memory_space<vmem>>, vector<1x150xf32>
    %14 = vector.broadcast %12 : f32 to vector<1x150xf32>
    %15 = arith.mulf %14, %13 : vector<1x150xf32>
    %16 = arith.addf %11, %15 : vector<1x150xf32>
    %c0_10 = arith.constant 0 : index
    %c3 = arith.constant 3 : index
    %17 = memref.load %arg0[%c0_10, %c3] : memref<2x4xf32, #tpu.memory_space<smem>>
    %c3_11 = arith.constant 3 : index
    %c0_12 = arith.constant 0 : index
    %18 = vector.load %arg2[%c3_11, %c0_12] : memref<4x150xf32, #tpu.memory_space<vmem>>, vector<1x150xf32>
    %19 = vector.broadcast %17 : f32 to vector<1x150xf32>
    %20 = arith.mulf %19, %18 : vector<1x150xf32>
    %21 = arith.addf %16, %20 : vector<1x150xf32>
    %c0_13 = arith.constant 0 : index
    %c0_14 = arith.constant 0 : index
    %22 = vector.load %arg3[%c0_13, %c0_14] : memref<2x150xf32, #tpu.memory_space<vmem>>, vector<1x150xf32>
    tpu.vector_store %arg3[%c0_13, %c0_14], %21 {strides = array<i32>} : memref<2x150xf32, #tpu.memory_space<vmem>>, vector<1x150xf32>,
    %c1_15 = arith.constant 1 : index
    %23 = memref.load %arg1[%c1_15] : memref<2xf32, #tpu.memory_space<smem>>
    %c1_16 = arith.constant 1 : index
    %c0_17 = arith.constant 0 : index
    %24 = memref.load %arg0[%c1_16, %c0_17] : memref<2x4xf32, #tpu.memory_space<smem>>
    %c0_18 = arith.constant 0 : index
    %c0_19 = arith.constant 0 : index
    %25 = vector.load %arg2[%c0_18, %c0_19] : memref<4x150xf32, #tpu.memory_space<vmem>>, vector<1x150xf32>
    %26 = vector.broadcast %24 : f32 to vector<1x150xf32>
    %27 = arith.mulf %26, %25 : vector<1x150xf32>
    %28 = vector.broadcast %23 : f32 to vector<1x150xf32>
    %29 = arith.addf %28, %27 : vector<1x150xf32>
    %c1_20 = arith.constant 1 : index
    %c1_21 = arith.constant 1 : index
    %30 = memref.load %arg0[%c1_20, %c1_21] : memref<2x4xf32, #tpu.memory_space<smem>>
    %c1_22 = arith.constant 1 : index
    %c0_23 = arith.constant 0 : index
    %31 = vector.load %arg2[%c1_22, %c0_23] : memref<4x150xf32, #tpu.memory_space<vmem>>, vector<1x150xf32>
    %32 = vector.broadcast %30 : f32 to vector<1x150xf32>
    %33 = arith.mulf %32, %31 : vector<1x150xf32>
    %34 = arith.addf %29, %33 : vector<1x150xf32>
    %c1_24 = arith.constant 1 : index
    %c2_25 = arith.constant 2 : index
    %35 = memref.load %arg0[%c1_24, %c2_25] : memref<2x4xf32, #tpu.memory_space<smem>>
    %c2_26 = arith.constant 2 : index
    %c0_27 = arith.constant 0 : index
    %36 = vector.load %arg2[%c2_26, %c0_27] : memref<4x150xf32, #tpu.memory_space<vmem>>, vector<1x150xf32>
    %37 = vector.broadcast %35 : f32 to vector<1x150xf32>
    %38 = arith.mulf %37, %36 : vector<1x150xf32>
    %39 = arith.addf %34, %38 : vector<1x150xf32>
    %c1_28 = arith.constant 1 : index
    %c3_29 = arith.constant 3 : index
    %40 = memref.load %arg0[%c1_28, %c3_29] : memref<2x4xf32, #tpu.memory_space<smem>>
    %c3_30 = arith.constant 3 : index
    %c0_31 = arith.constant 0 : index
    %41 = vector.load %arg2[%c3_30, %c0_31] : memref<4x150xf32, #tpu.memory_space<vmem>>, vector<1x150xf32>
    %42 = vector.broadcast %40 : f32 to vector<1x150xf32>
    %43 = arith.mulf %42, %41 : vector<1x150xf32>
    %44 = arith.addf %39, %43 : vector<1x150xf32>
    %c1_32 = arith.constant 1 : index
    %c0_33 = arith.constant 0 : index
    %45 = vector.load %arg3[%c1_32, %c0_33] : memref<2x150xf32, #tpu.memory_space<vmem>>, vector<1x150xf32>
    tpu.vector_store %arg3[%c1_32, %c0_33], %44 {strides = array<i32>} : memref<2x150xf32, #tpu.memory_space<vmem>>, vector<1x150xf32>,
    return
  }
}

</mosaic_0001>

<bundles_post_ra>
// kernel: linear_regression_forward.1
= control target key start
LH: loop header
LB: loop body
LE: loop exit
PB: predicated region body
PF: predicated region fallthrough
CT: control target
= control target key end

     0   :  { %8 = vsyncpa [#allocation5], 0  ;;  %s268_s0 = inlined_call_operand.vmem [shape: f32[2,4], index: 0, kind: input, shape index: {}]   ;;  %s269_s1 = inlined_call_operand.vmem [shape: f32[2], index: 1, kind: input, shape index: {}]   ;;  %s270_s2 = inlined_call_operand.hbm [shape: f32[4,150], index: 2, kind: input, shape index: {}]   ;;  %s271_s3 = inlined_call_operand.hbm [shape: f32[2,150], index: 3, kind: output, shape index: {}]  }
   0x1   :  { %9 = vsyncpa [#allocation7], 0 }
   0x2   :  { %10 = vsyncpa [#allocation3], 0 }
   0x3   :  { %11 = vsyncpa [#allocation4], 0  ;;  %s18_s14 = sshll.u32 %s268_s0, 4  ;;  %s28_s17 = sshll.u32 %s269_s1, 4  ;;  %s19_s14 = int_to_ptr.vmem [resolvable:$true] %s18_s14  ;;  %s29_s17 = int_to_ptr.vmem [resolvable:$true] %s28_s17 }
   0x4   :  { %s135_s18 = scalar_lea.vmem %s19_s14, 32  ;;  %p140_p1 = scmp.lt.s32.totalorder %s19_s14, %s19_s14 }
   0x5   :  { %p136_p0 = scmp.ne.s32.totalorder %s19_s14, %s135_s18  ;;  %p141_p2 = scmp.lt.s32.totalorder %s135_s18, %s135_s18 }
   0x7   :  { %p142_p3 = por %p141_p2, %p140_p1 }
   0x9   :  { %p143_p4 = pnand %p142_p3, %p136_p0 }
   0xb   :  { %146 = shalt.err (!%p143_p4)
}
   0xc   :  { %s211_s19 = smov [#allocation2]   ;;  %s147_s20 = scalar_lea.vmem %s29_s17, 16 }
   0xd   :  { %21 = dma.vmem_to_smem %s19_s14, 32, %s211_s19, [#allocation5]  }
   0xe   :  { %p148_p5 = scmp.ne.s32.totalorder %s29_s17, %s147_s20  ;;  %p152_p6 = scmp.lt.s32.totalorder %s29_s17, %s29_s17 }
   0xf   :  { %p153_p7 = scmp.lt.s32.totalorder %s147_s20, %s147_s20 }
  0x11   :  { %p154_p8 = por %p153_p7, %p152_p6 }
  0x13   :  { %p155_p9 = pnand %p154_p8, %p148_p5 }
  0x15   :  { %158 = shalt.err (!%p155_p9)
}
  0x16   :  { %s212_s0 = smov [#allocation6]   ;;  %s213_s1 = smov [#allocation8]  }
  0x17   :  { %31 = dma.vmem_to_smem %s29_s17, 16, %s212_s0, [#allocation7]  }
  0x18   :  { %s38_s21 = sshll.u32 %s213_s1, 4  ;;  %s159_s24 = scalar_lea.hbm %s270_s2, 128  ;;  %s39_s21 = int_to_ptr.vmem [resolvable:$true] %s38_s21 }
  0x19   :  { %p160_p10 = scmp.ne.s32.totalorder %s270_s2, %s159_s24  ;;  %p163_p11 = scmp.lt.u32.totalorder %s159_s24, %s270_s2 }
  0x1b   :  { %p165_p12 = pnand %p163_p11, %p160_p10 }
  0x1d   :  { %168 = shalt.err (!%p165_p12)
}
  0x1e   :  { %s169_s29 = scalar_lea.vmem %s39_s21, 128  ;;  %p174_p0 = scmp.lt.s32.totalorder %s39_s21, %s39_s21 }
  0x1f   :  { %p170_p13 = scmp.ne.s32.totalorder %s39_s21, %s169_s29  ;;  %p175_p1 = scmp.lt.s32.totalorder %s169_s29, %s169_s29 }
  0x21   :  { %p176_p2 = por %p175_p1, %p174_p0 }
  0x23   :  { %p177_p3 = pnand %p176_p2, %p170_p13 }
  0x25   :  { %180 = shalt.err (!%p177_p3)
}
  0x26   :  { %41 = dma.hbm_to_vmem [thread:$0]  %s270_s2, 128, %s39_s21, [#allocation3]  }
  0x27   :  { %203 = dma.done.wait [#allocation5], 32  }
  0x28   :  { %204 = vsyncadd [#allocation5], 4294967264 }
  0x29   :  { %205 = dma.done.wait [#allocation7], 16  }
  0x2a   :  { %206 = vsyncadd [#allocation7], 4294967280 }
  0x2b   :  { %207 = dma.done.wait [#allocation3], 128  }
  0x2c   :  { %208 = vsyncadd [#allocation3], 4294967168 }
  0x2d   :  { %51 = sfence }
  0x2e   :  { %s52_s5 = sld [smem:[#allocation6]]  ;;  %s123_s7 = sld [smem:[#allocation2 + $0x1]]  ;;  %v54_v0 = vld [vmem:[#allocation8] ss:$4 sm:$0x3]  ;;  %v77_v14 = vlaneseq }
  0x2f   :  { %s53_s6 = sld [smem:[#allocation2]]  ;;  %s124_s8 = sld [smem:[#allocation2 + $0x2]]  ;;  %v61_v1 = vld [vmem:[#allocation8 + $0x1] ss:$4 sm:$0x3] }
  0x30   :  { %s125_s9 = sld [smem:[#allocation2 + $0x3]]  ;;  %s253_s10 = sld [smem:[#allocation6 + $0x1]]  ;;  %v67_v4 = vld [vmem:[#allocation8 + $0x2] ss:$4 sm:$0x3]  ;;  %vm79_vm0 = vcmp.lt.s32.totalorder %v77_v14, 150 }
  0x31   :  { %s127_s11 = sld [smem:[#allocation2 + $0x80]]  ;;  %s128_s2 = sld [smem:[#allocation2 + $0x81]]  ;;  %v73_v9 = vld [vmem:[#allocation8 + $0x3] ss:$4 sm:$0x3] }
  0x32   :  { %s129_s12 = sld [smem:[#allocation2 + $0x82]]  ;;  %s130_s13 = sld [smem:[#allocation2 + $0x83]]  ;;  %v84_v13 = vld [vmem:[#allocation8] ss:$4 sm:$0x3] }
  0x33   :  { %v90_v15 = vld [vmem:[#allocation8 + $0x1] ss:$4 sm:$0x3]  ;;  %v95_v20 = vld [vmem:[#allocation8 + $0x2] ss:$4 sm:$0x3] }
  0x34   :  { %v57_v3 = vstv %s52_s5  ;;  %v62_v6 = vstv %s123_s7  ;;  %v100_v26 = vld [vmem:[#allocation8 + $0x3] ss:$4 sm:$0x3]  ;;  %s214_s14 = smov [#allocation9]  }
  0x35   :  { %v55_v2 = vstv %s53_s6  ;;  %v63_v7 = vmul.f32 %v62_v6, %v61_v1  ;;  %v68_v8 = vstv %s124_s8  ;;  %s112_s15 = sshll.u32 %s214_s14, 4  ;;  %s113_s15 = int_to_ptr.vmem [resolvable:$true] %s112_s15 }
  0x36   :  { %v56_v5 = vmul.f32 %v55_v2, %v54_v0  ;;  %v69_v11 = vmul.f32 %v68_v8, %v67_v4  ;;  %v74_v12 = vstv %s125_s9  ;;  %v87_v19 = vstv %s253_s10  ;;  %s181_s16 = scalar_lea.vmem %s113_s15, 64  ;;  %p186_p5 = scmp.lt.s32.totalorder %s113_s15, %s113_s15 }
  0x37   :  { %v75_v17 = vmul.f32 %v74_v12, %v73_v9  ;;  %v85_v18 = vstv %s127_s11  ;;  %v91_v22 = vstv %s128_s2  ;;  %p182_p4 = scmp.ne.s32.totalorder %s113_s15, %s181_s16  ;;  %p187_p6 = scmp.lt.s32.totalorder %s181_s16, %s181_s16 }
  0x38   :  { %v58_v10 = vadd.f32 %v57_v3, %v56_v5  ;;  %v86_v21 = vmul.f32 %v85_v18, %v84_v13  ;;  %v92_v24 = vmul.f32 %v91_v22, %v90_v15  ;;  %v96_v25 = vstv %s129_s12 }
  0x39   :  { %v97_v28 = vmul.f32 %v96_v25, %v95_v20  ;;  %v101_v29 = vstv %s130_s13  ;;  %p188_p7 = por %p187_p6, %p186_p5 }
  0x3a   :  { %v64_v16 = vadd.f32 %v63_v7, %v58_v10  ;;  %v88_v27 = vadd.f32 %v87_v19, %v86_v21  ;;  %v102_v32 = vmul.f32 %v101_v29, %v100_v26 }
  0x3b   :  { %p189_p8 = pnand %p188_p7, %p182_p4 }
  0x3c   :  { %v70_v23 = vadd.f32 %v69_v11, %v64_v16  ;;  %v93_v31 = vadd.f32 %v92_v24, %v88_v27 }
  0x3e   :  { %v76_v30 = vadd.f32 %v75_v17, %v70_v23  ;;  %v98_v33 = vadd.f32 %v97_v28, %v93_v31 }
  0x40   :  { %81 = vst.msk [vmem:[#allocation9] ss:$2 sm:$0x3] %vm79_vm0, %v76_v30  ;;  %v103_v34 = vadd.f32 %v102_v32, %v98_v33 }
  0x42   :  { %105 = vst.msk [vmem:[#allocation9 + $0x1] ss:$2 sm:$0x3] %vm79_vm0, %v103_v34 }
  0x43   :  { %192 = shalt.err (!%p189_p8)
}
  0x44   :  { %s193_s19 = scalar_lea.hbm %s271_s3, 64 }
  0x45   :  { %p194_p9 = scmp.ne.s32.totalorder %s271_s3, %s193_s19  ;;  %p197_p10 = scmp.lt.u32.totalorder %s193_s19, %s271_s3 }
  0x47   :  { %p199_p11 = pnand %p197_p10, %p194_p9 }
  0x49   :  { %202 = shalt.err (!%p199_p11)
}
  0x4a   :  { %115 = dma.vmem_to_hbm [thread:$0]  %s113_s15, 64, %s271_s3, [#allocation4]  }
  0x4b   :  { %209 = dma.done.wait [#allocation4], 64  }
  0x4c   :  { %210 = vsyncadd [#allocation4], 4294967232 }
  0x4d   :  { %119 = vsyncpa [#allocation3], 1 }
  0x4e   :  { %120 = vsyncpa [#allocation4], 1 }
  0x4f   :  { %121 = vsyncpa [#allocation5], 1 }
  0x50   :  { %122 = vsyncpa [#allocation7], 1 }

</bundles_post_ra>
